<compile_context>
chip_gen: v6e
topology: v6e:2x2x1
jax: 0.10.0
libtpu: 0.0.40
codegen_flags: <defaults>
</compile_context>

<pallas_src>
import math

import jax
import jax.numpy as jnp
from jax.experimental import pallas as pl
from jax.experimental.pallas import tpu as pltpu

# ---------------- synthetic T5 config (small) ----------------
VOCAB = 64
D_MODEL = 32          # d_model
D_FF = 64             # d_ff (gated)
NUM_HEADS = 4
D_KV = 8              # per-head dim (NUM_HEADS * D_KV == D_MODEL here)
NUM_LAYERS = 2
SEQ = 8               # stands in for max_length=77
BATCH = 2
NUM_BUCKETS = 32
MAX_DISTANCE = 128
LN_EPS = 1e-6


# ---------------- in-kernel helpers ----------------
def _rmsnorm(x, w):
    # T5LayerNorm: no mean subtraction, no bias.
    var = jnp.mean(x * x, axis=-1, keepdims=True)
    return x * jax.lax.rsqrt(var + LN_EPS) * w


def _gelu_new(x):
    # HF "gelu_new" (tanh approximation) used by T5 v1.1 gated FFN.
    return 0.5 * x * (1.0 + jnp.tanh(0.7978845608028654 * (x + 0.044715 * x * x * x)))


# ---------------- fused encoder kernel ----------------
def t5_encoder_kernel(x_ref, bias_ref,
                      ln1_ref, wq_ref, wk_ref, wv_ref, wo_ref,
                      ln2_ref, wi0_ref, wi1_ref, wff_ref, fln_ref,
                      out_ref, x_scr):
    """grid = (B, L).  One grid step = one encoder block for one batch element.

    The activation for the current batch element stays resident in `x_scr`
    (VMEM) across the layer axis; HBM is only touched for the initial load
    (l == 0) and the final store (l == L-1, after the final RMSNorm).
    """
    l = pl.program_id(1)

    @pl.when(l == 0)
    def _():
        x_scr[...] = x_ref[0]

    x = x_scr[...]                                           # (S, D) f32

    # ---- self-attention sub-layer (all heads batched) ----
    h = _rmsnorm(x, ln1_ref[0])                              # (S, D)
    hb = jnp.broadcast_to(h, (NUM_HEADS,) + h.shape)         # (H, S, D)

    q = jnp.einsum('hsd,hdk->hsk', hb, wq_ref[0],
                   preferred_element_type=jnp.float32)       # (H, S, dk)
    k = jnp.einsum('hsd,hdk->hsk', hb, wk_ref[0],
                   preferred_element_type=jnp.float32)       # (H, S, dk)
    v = jnp.einsum('hsd,hdk->hsk', hb, wv_ref[0],
                   preferred_element_type=jnp.float32)       # (H, S, dk)

    # T5 does NOT scale scores by 1/sqrt(dk).
    scores = jnp.einsum('hqc,hkc->hqk', q, k,
                        preferred_element_type=jnp.float32)  # (H, S, S)
    scores = scores + bias_ref[...]                          # rel-pos bias, one add
    scores = scores - jnp.max(scores, axis=-1, keepdims=True)
    probs = jnp.exp(scores)
    probs = probs * pl.reciprocal(jnp.sum(probs, axis=-1, keepdims=True),
                                  approx=True)

    ctx = jnp.einsum('hqk,hkc->hqc', probs, v,
                     preferred_element_type=jnp.float32)     # (H, S, dk)
    attn = jnp.einsum('hqc,hcd->hqd', ctx, wo_ref[0],
                      preferred_element_type=jnp.float32)    # (H, S, D)
    x = x + jnp.sum(attn, axis=0)                            # residual

    # ---- gated-GELU feed-forward sub-layer (T5 v1.1 DenseGatedActDense) ----
    h2 = _rmsnorm(x, ln2_ref[0])                             # (S, D)
    g = _gelu_new(jnp.dot(h2, wi0_ref[0], preferred_element_type=jnp.float32))
    u = jnp.dot(h2, wi1_ref[0], preferred_element_type=jnp.float32)
    x = x + jnp.dot(g * u, wff_ref[0], preferred_element_type=jnp.float32)

    x_scr[...] = x                                           # keep resident

    @pl.when(l == pl.num_programs(1) - 1)
    def _():
        out_ref[0] = _rmsnorm(x, fln_ref[...])               # final LN + store


# ---------------- wrapper ----------------
def t5_encoder_fused(x, bias, packed):
    B, S, D = x.shape
    L, H, dk, F = NUM_LAYERS, NUM_HEADS, D_KV, D_FF

    in_specs = [
        pl.BlockSpec((1, S, D), lambda b, l: (b, 0, 0)),          # x (per batch)
        pl.BlockSpec((H, S, S), lambda b, l: (0, 0, 0)),          # rel-pos bias
        pl.BlockSpec((1, 1, D), lambda b, l: (l, 0, 0)),          # ln1  (layer-streamed)
        pl.BlockSpec((1, H, D, dk), lambda b, l: (l, 0, 0, 0)),   # wq
        pl.BlockSpec((1, H, D, dk), lambda b, l: (l, 0, 0, 0)),   # wk
        pl.BlockSpec((1, H, D, dk), lambda b, l: (l, 0, 0, 0)),   # wv
        pl.BlockSpec((1, H, dk, D), lambda b, l: (l, 0, 0, 0)),   # wo
        pl.BlockSpec((1, 1, D), lambda b, l: (l, 0, 0)),          # ln2
        pl.BlockSpec((1, D, F), lambda b, l: (l, 0, 0)),          # wi0
        pl.BlockSpec((1, D, F), lambda b, l: (l, 0, 0)),          # wi1
        pl.BlockSpec((1, F, D), lambda b, l: (l, 0, 0)),          # wff
        pl.BlockSpec((1, D), lambda b, l: (0, 0)),                # final LN weight
    ]
    return pl.pallas_call(
        t5_encoder_kernel,
        out_shape=jax.ShapeDtypeStruct((B, S, D), jnp.float32),
        grid_spec=pltpu.PrefetchScalarGridSpec(
            num_scalar_prefetch=0,
            grid=(B, L),                       # batch parallel, layers arbitrary
            in_specs=in_specs,
            out_specs=pl.BlockSpec((1, S, D), lambda b, l: (b, 0, 0)),
            scratch_shapes=[pltpu.VMEM((S, D), jnp.float32)]),
        compiler_params=pltpu.CompilerParams(
            dimension_semantics=("parallel", "arbitrary")),
    )(x, bias,
      packed["ln1"], packed["wq"], packed["wk"], packed["wv"], packed["wo"],
      packed["ln2"], packed["wi0"], packed["wi1"], packed["wff"],
      packed["final_ln"])


# ---------------- glue: relative position bias (integer bucketing) ----------------
def _relative_position_bucket(rel_pos, num_buckets=NUM_BUCKETS, max_distance=MAX_DISTANCE):
    # bidirectional (encoder) variant, matching HF T5Attention._relative_position_bucket
    num_buckets = num_buckets // 2
    buckets = (rel_pos > 0).astype(jnp.int32) * num_buckets
    rel = jnp.abs(rel_pos)
    max_exact = num_buckets // 2
    is_small = rel < max_exact
    rel_f = jnp.maximum(rel, 1).astype(jnp.float32)
    val_if_large = max_exact + (
        jnp.log(rel_f / max_exact) / math.log(max_distance / max_exact)
        * (num_buckets - max_exact)
    ).astype(jnp.int32)
    val_if_large = jnp.minimum(val_if_large, num_buckets - 1)
    buckets = buckets + jnp.where(is_small, rel, val_if_large)
    return buckets


def compute_position_bias(rel_bias_table, seq_len):
    ctx = jnp.arange(seq_len)[:, None]
    mem = jnp.arange(seq_len)[None, :]
    buckets = _relative_position_bucket(mem - ctx)             # (S, S)
    bias = rel_bias_table[buckets]                             # (S, S, H) gather (glue)
    return jnp.transpose(bias, (2, 0, 1)).astype(jnp.float32)  # (H, S, S)


# ---------------- parameter init (deterministic, synthetic) ----------------
def init_params(key):
    ks = jax.random.split(key, 4 + NUM_LAYERS)
    scale = 0.02
    params = {
        "embed": jax.random.normal(ks[0], (VOCAB, D_MODEL), jnp.float32) * scale,
        "rel_bias": jax.random.normal(ks[1], (NUM_BUCKETS, NUM_HEADS), jnp.float32) * scale,
        "final_ln": jnp.ones((1, D_MODEL), jnp.float32),
        "layers": [],
    }
    for li in range(NUM_LAYERS):
        lk = jax.random.split(ks[4 + li], 8)
        params["layers"].append({
            "ln1": jnp.ones((1, D_MODEL), jnp.float32),
            "wq": jax.random.normal(lk[0], (D_MODEL, NUM_HEADS * D_KV), jnp.float32) * scale,
            "wk": jax.random.normal(lk[1], (D_MODEL, NUM_HEADS * D_KV), jnp.float32) * scale,
            "wv": jax.random.normal(lk[2], (D_MODEL, NUM_HEADS * D_KV), jnp.float32) * scale,
            "wo": jax.random.normal(lk[3], (NUM_HEADS * D_KV, D_MODEL), jnp.float32) * scale,
            "ln2": jnp.ones((1, D_MODEL), jnp.float32),
            "wi0": jax.random.normal(lk[4], (D_MODEL, D_FF), jnp.float32) * scale,
            "wi1": jax.random.normal(lk[5], (D_MODEL, D_FF), jnp.float32) * scale,
            "wff": jax.random.normal(lk[6], (D_FF, D_MODEL), jnp.float32) * scale,
        })
    return params


def pack_params(params):
    """Stack per-layer weights along a leading L axis and reshape attention
    projections to head-major layouts so the kernel can batch all heads."""
    L, D, H, dk = NUM_LAYERS, D_MODEL, NUM_HEADS, D_KV

    def stack(name):
        return jnp.stack([params["layers"][i][name] for i in range(L)], axis=0)

    # (L, D, H*dk) -> (L, H, D, dk)   (column block h == head h of the original)
    wq = stack("wq").reshape(L, D, H, dk).transpose(0, 2, 1, 3)
    wk = stack("wk").reshape(L, D, H, dk).transpose(0, 2, 1, 3)
    wv = stack("wv").reshape(L, D, H, dk).transpose(0, 2, 1, 3)
    # (L, H*dk, D) -> (L, H, dk, D)   (row block h == head h of the original)
    wo = stack("wo").reshape(L, H, dk, D)

    return {
        "embed": params["embed"],
        "rel_bias": params["rel_bias"],
        "final_ln": params["final_ln"],          # (1, D)
        "ln1": stack("ln1"),                     # (L, 1, D)
        "ln2": stack("ln2"),                     # (L, 1, D)
        "wq": wq, "wk": wk, "wv": wv,            # (L, H, D, dk)
        "wo": wo,                                # (L, H, dk, D)
        "wi0": stack("wi0"),                     # (L, D, F)
        "wi1": stack("wi1"),                     # (L, D, F)
        "wff": stack("wff"),                     # (L, F, D)
    }


# ---------------- full forward ----------------
@jax.jit
def frozen_t5_embedder_forward(tokens, packed):
    """tokens: (B, S) int32 -> last_hidden_state (B, S, D_MODEL) float32."""
    # TODO(synk): string tokenization (T5Tokenizer) has no Pallas equivalent;
    # tokens are supplied as precomputed int ids (already padded to max_length).
    x = packed["embed"][tokens].astype(jnp.float32)                 # (B, S, D) gather (glue)
    bias = compute_position_bias(packed["rel_bias"], tokens.shape[1])  # shared by all layers
    return t5_encoder_fused(x, bias, packed)


if __name__ == "__main__":
    key = jax.random.PRNGKey(0)
    pkey, tkey = jax.random.split(key)
    params = init_params(pkey)
    packed = pack_params(params)
    tokens = jax.random.randint(tkey, (BATCH, SEQ), 0, VOCAB, dtype=jnp.int32)

    z = frozen_t5_embedder_forward(tokens, packed)
    jax.block_until_ready(z)
    assert z.shape == (BATCH, SEQ, D_MODEL) and z.dtype == jnp.float32
    assert bool(jnp.all(jnp.isfinite(z)))
    print("KERNEL_OK")
</pallas_src>

<mosaic_0001>
module attributes {stable_mosaic.version = 11 : i64} {
  func.func @t5_encoder_kernel(%arg0: i32, %arg1: i32, %arg2: memref<1x8x32xf32, #tpu.memory_space<vmem>>, %arg3: memref<4x8x8xf32, #tpu.memory_space<vmem>>, %arg4: memref<1x1x32xf32, #tpu.memory_space<vmem>>, %arg5: memref<1x4x32x8xf32, #tpu.memory_space<vmem>>, %arg6: memref<1x4x32x8xf32, #tpu.memory_space<vmem>>, %arg7: memref<1x4x32x8xf32, #tpu.memory_space<vmem>>, %arg8: memref<1x4x8x32xf32, #tpu.memory_space<vmem>>, %arg9: memref<1x1x32xf32, #tpu.memory_space<vmem>>, %arg10: memref<1x32x64xf32, #tpu.memory_space<vmem>>, %arg11: memref<1x32x64xf32, #tpu.memory_space<vmem>>, %arg12: memref<1x64x32xf32, #tpu.memory_space<vmem>>, %arg13: memref<1x32xf32, #tpu.memory_space<vmem>>, %arg14: memref<1x8x32xf32, #tpu.memory_space<vmem>>, %arg15: memref<8x32xf32, #tpu.memory_space<vmem>>) attributes {dimension_semantics = [#tpu.dimension_semantics<parallel>, #tpu.dimension_semantics<arbitrary>], iteration_bounds = array<i64: 2, 2>, scalar_prefetch = 0 : i64, scratch_operands = 1 : i64, tpu.core_type = #tpu.core_type<tc>, window_params = [{transform_indices = @transform_0, window_bounds = array<i64: 1, 8, 32>}, {pipeline_mode = #tpu.pipeline_mode<synchronous>, transform_indices = @transform_1, window_bounds = array<i64: 4, 8, 8>}, {transform_indices = @transform_2, window_bounds = array<i64: 1, 1, 32>}, {transform_indices = @transform_3, window_bounds = array<i64: 1, 4, 32, 8>}, {transform_indices = @transform_4, window_bounds = array<i64: 1, 4, 32, 8>}, {transform_indices = @transform_5, window_bounds = array<i64: 1, 4, 32, 8>}, {transform_indices = @transform_6, window_bounds = array<i64: 1, 4, 8, 32>}, {transform_indices = @transform_7, window_bounds = array<i64: 1, 1, 32>}, {transform_indices = @transform_8, window_bounds = array<i64: 1, 32, 64>}, {transform_indices = @transform_9, window_bounds = array<i64: 1, 32, 64>}, {transform_indices = @transform_10, window_bounds = array<i64: 1, 64, 32>}, {pipeline_mode = #tpu.pipeline_mode<synchronous>, transform_indices = @transform_11, window_bounds = array<i64: 1, 32>}, {transform_indices = @transform_12, window_bounds = array<i64: 1, 8, 32>}]} {
    %c0_i32 = arith.constant 0 : i32
    %0 = arith.cmpi eq, %arg1, %c0_i32 : i32
    %1 = arith.extui %0 : i1 to i32
    %c0_i32_0 = arith.constant 0 : i32
    %2 = arith.cmpi ne, %1, %c0_i32_0 : i32
    scf.if %2 {
      %c0_60 = arith.constant 0 : index
      %c0_61 = arith.constant 0 : index
      %c0_62 = arith.constant 0 : index
      %90 = vector.load %arg2[%c0_60, %c0_61, %c0_62] : memref<1x8x32xf32, #tpu.memory_space<vmem>>, vector<1x8x32xf32>
      %91 = vector.shape_cast %90 : vector<1x8x32xf32> to vector<8x32xf32>
      %c0_63 = arith.constant 0 : index
      %c0_64 = arith.constant 0 : index
      %92 = vector.load %arg15[%c0_63, %c0_64] : memref<8x32xf32, #tpu.memory_space<vmem>>, vector<8x32xf32>
      tpu.vector_store %arg15[%c0_63, %c0_64], %91 {strides = array<i32>} : memref<8x32xf32, #tpu.memory_space<vmem>>, vector<8x32xf32>,
    } else {
    }
    %c0 = arith.constant 0 : index
    %c0_1 = arith.constant 0 : index
    %3 = vector.load %arg15[%c0, %c0_1] : memref<8x32xf32, #tpu.memory_space<vmem>>, vector<8x32xf32>
    %c0_2 = arith.constant 0 : index
    %c0_3 = arith.constant 0 : index
    %c0_4 = arith.constant 0 : index
    %4 = vector.load %arg4[%c0_2, %c0_3, %c0_4] : memref<1x1x32xf32, #tpu.memory_space<vmem>>, vector<1x1x32xf32>
    %5 = vector.shape_cast %4 : vector<1x1x32xf32> to vector<1x32xf32>
    %6 = arith.mulf %3, %3 : vector<8x32xf32>
    %cst = arith.constant dense<0.000000e+00> : vector<8xf32>
    %7 = vector.multi_reduction <add>, %6, %cst [1] : vector<8x32xf32> to vector<8xf32>
    %8 = vector.shape_cast %7 : vector<8xf32> to vector<8x1xf32>
    %cst_5 = arith.constant 3.200000e+01 : f32
    %9 = vector.broadcast %cst_5 : f32 to vector<8x1xf32>
    %10 = arith.divf %8, %9 : vector<8x1xf32>
    %cst_6 = arith.constant 9.99999997E-7 : f32
    %11 = vector.broadcast %cst_6 : f32 to vector<8x1xf32>
    %12 = arith.addf %10, %11 : vector<8x1xf32>
    %13 = math.rsqrt %12 : vector<8x1xf32>
    %14 = vector.broadcast %13 : vector<8x1xf32> to vector<8x32xf32>
    %15 = arith.mulf %3, %14 : vector<8x32xf32>
    %16 = vector.broadcast %5 : vector<1x32xf32> to vector<8x32xf32>
    %17 = arith.mulf %15, %16 : vector<8x32xf32>
    %18 = vector.shape_cast %17 : vector<8x32xf32> to vector<1x8x32xf32>
    %19 = vector.broadcast %18 : vector<1x8x32xf32> to vector<4x8x32xf32>
    %c0_7 = arith.constant 0 : index
    %c0_8 = arith.constant 0 : index
    %c0_9 = arith.constant 0 : index
    %c0_10 = arith.constant 0 : index
    %20 = vector.load %arg5[%c0_7, %c0_8, %c0_9, %c0_10] : memref<1x4x32x8xf32, #tpu.memory_space<vmem>>, vector<1x4x32x8xf32>
    %21 = vector.shape_cast %20 : vector<1x4x32x8xf32> to vector<4x32x8xf32>
    "tpu.trace_start"() <{level = 10 : i32, message = "hsd,hdk->hsk"}> : () -> ()
    %cst_11 = arith.constant dense<0.000000e+00> : vector<4x8x8xf32>
    %22 = tpu.matmul %19, %21, %cst_11 {dimension_numbers = #tpu.dot_dimension_numbers<[2], [1], [1], [2], [0, 0, 0, 1, 1, 2], [0], [0]>} : vector<4x8x32xf32>, vector<4x32x8xf32>, vector<4x8x8xf32> -> vector<4x8x8xf32>
    "tpu.trace_stop"() : () -> ()
    %c0_12 = arith.constant 0 : index
    %c0_13 = arith.constant 0 : index
    %c0_14 = arith.constant 0 : index
    %c0_15 = arith.constant 0 : index
    %23 = vector.load %arg6[%c0_12, %c0_13, %c0_14, %c0_15] : memref<1x4x32x8xf32, #tpu.memory_space<vmem>>, vector<1x4x32x8xf32>
    %24 = vector.shape_cast %23 : vector<1x4x32x8xf32> to vector<4x32x8xf32>
    "tpu.trace_start"() <{level = 10 : i32, message = "hsd,hdk->hsk"}> : () -> ()
    %cst_16 = arith.constant dense<0.000000e+00> : vector<4x8x8xf32>
    %25 = tpu.matmul %19, %24, %cst_16 {dimension_numbers = #tpu.dot_dimension_numbers<[2], [1], [1], [2], [0, 0, 0, 1, 1, 2], [0], [0]>} : vector<4x8x32xf32>, vector<4x32x8xf32>, vector<4x8x8xf32> -> vector<4x8x8xf32>
    "tpu.trace_stop"() : () -> ()
    %c0_17 = arith.constant 0 : index
    %c0_18 = arith.constant 0 : index
    %c0_19 = arith.constant 0 : index
    %c0_20 = arith.constant 0 : index
    %26 = vector.load %arg7[%c0_17, %c0_18, %c0_19, %c0_20] : memref<1x4x32x8xf32, #tpu.memory_space<vmem>>, vector<1x4x32x8xf32>
    %27 = vector.shape_cast %26 : vector<1x4x32x8xf32> to vector<4x32x8xf32>
    "tpu.trace_start"() <{level = 10 : i32, message = "hsd,hdk->hsk"}> : () -> ()
    %cst_21 = arith.constant dense<0.000000e+00> : vector<4x8x8xf32>
    %28 = tpu.matmul %19, %27, %cst_21 {dimension_numbers = #tpu.dot_dimension_numbers<[2], [1], [1], [2], [0, 0, 0, 1, 1, 2], [0], [0]>} : vector<4x8x32xf32>, vector<4x32x8xf32>, vector<4x8x8xf32> -> vector<4x8x8xf32>
    "tpu.trace_stop"() : () -> ()
    "tpu.trace_start"() <{level = 10 : i32, message = "hqc,hkc->hqk"}> : () -> ()
    %cst_22 = arith.constant dense<0.000000e+00> : vector<4x8x8xf32>
    %29 = tpu.matmul %22, %25, %cst_22 {dimension_numbers = #tpu.dot_dimension_numbers<[2], [2], [1], [1], [0, 0, 0, 1, 1, 1], [0], [0]>} : vector<4x8x8xf32>, vector<4x8x8xf32>, vector<4x8x8xf32> -> vector<4x8x8xf32>
    "tpu.trace_stop"() : () -> ()
    %c0_23 = arith.constant 0 : index
    %c0_24 = arith.constant 0 : index
    %c0_25 = arith.constant 0 : index
    %30 = vector.load %arg3[%c0_23, %c0_24, %c0_25] : memref<4x8x8xf32, #tpu.memory_space<vmem>>, vector<4x8x8xf32>
    %31 = arith.addf %29, %30 : vector<4x8x8xf32>
    %cst_26 = arith.constant dense<0xFF800000> : vector<4x8xf32>
    %32 = vector.multi_reduction <maximumf>, %31, %cst_26 [2] : vector<4x8x8xf32> to vector<4x8xf32>
    %33 = vector.shape_cast %32 : vector<4x8xf32> to vector<4x8x1xf32>
    %34 = vector.broadcast %33 : vector<4x8x1xf32> to vector<4x8x8xf32>
    %35 = arith.subf %31, %34 : vector<4x8x8xf32>
    %36 = math.exp %35 : vector<4x8x8xf32>
    %cst_27 = arith.constant dense<0.000000e+00> : vector<4x8xf32>
    %37 = vector.multi_reduction <add>, %36, %cst_27 [2] : vector<4x8x8xf32> to vector<4x8xf32>
    %38 = vector.shape_cast %37 : vector<4x8xf32> to vector<4x8x1xf32>
    %39 = tpu.reciprocal %38 {approx = true} : vector<4x8x1xf32> -> vector<4x8x1xf32>
    %40 = vector.broadcast %39 : vector<4x8x1xf32> to vector<4x8x8xf32>
    %41 = arith.mulf %36, %40 : vector<4x8x8xf32>
    "tpu.trace_start"() <{level = 10 : i32, message = "hqk,hkc->hqc"}> : () -> ()
    %cst_28 = arith.constant dense<0.000000e+00> : vector<4x8x8xf32>
    %42 = tpu.matmul %41, %28, %cst_28 {dimension_numbers = #tpu.dot_dimension_numbers<[2], [1], [1], [2], [0, 0, 0, 1, 1, 2], [0], [0]>} : vector<4x8x8xf32>, vector<4x8x8xf32>, vector<4x8x8xf32> -> vector<4x8x8xf32>
    "tpu.trace_stop"() : () -> ()
    %c0_29 = arith.constant 0 : index
    %c0_30 = arith.constant 0 : index
    %c0_31 = arith.constant 0 : index
    %c0_32 = arith.constant 0 : index
    %43 = vector.load %arg8[%c0_29, %c0_30, %c0_31, %c0_32] : memref<1x4x8x32xf32, #tpu.memory_space<vmem>>, vector<1x4x8x32xf32>
    %44 = vector.shape_cast %43 : vector<1x4x8x32xf32> to vector<4x8x32xf32>
    "tpu.trace_start"() <{level = 10 : i32, message = "hqc,hcd->hqd"}> : () -> ()
    %cst_33 = arith.constant dense<0.000000e+00> : vector<4x8x32xf32>
    %45 = tpu.matmul %42, %44, %cst_33 {dimension_numbers = #tpu.dot_dimension_numbers<[2], [1], [1], [2], [0, 0, 0, 1, 1, 2], [0], [0]>} : vector<4x8x8xf32>, vector<4x8x32xf32>, vector<4x8x32xf32> -> vector<4x8x32xf32>
    "tpu.trace_stop"() : () -> ()
    %cst_34 = arith.constant dense<0.000000e+00> : vector<8x32xf32>
    %46 = vector.multi_reduction <add>, %45, %cst_34 [0] : vector<4x8x32xf32> to vector<8x32xf32>
    %47 = arith.addf %3, %46 : vector<8x32xf32>
    %c0_35 = arith.constant 0 : index
    %c0_36 = arith.constant 0 : index
    %c0_37 = arith.constant 0 : index
    %48 = vector.load %arg9[%c0_35, %c0_36, %c0_37] : memref<1x1x32xf32, #tpu.memory_space<vmem>>, vector<1x1x32xf32>
    %49 = vector.shape_cast %48 : vector<1x1x32xf32> to vector<1x32xf32>
    %50 = arith.mulf %47, %47 : vector<8x32xf32>
    %cst_38 = arith.constant dense<0.000000e+00> : vector<8xf32>
    %51 = vector.multi_reduction <add>, %50, %cst_38 [1] : vector<8x32xf32> to vector<8xf32>
    %52 = vector.shape_cast %51 : vector<8xf32> to vector<8x1xf32>
    %cst_39 = arith.constant 3.200000e+01 : f32
    %53 = vector.broadcast %cst_39 : f32 to vector<8x1xf32>
    %54 = arith.divf %52, %53 : vector<8x1xf32>
    %cst_40 = arith.constant 9.99999997E-7 : f32
    %55 = vector.broadcast %cst_40 : f32 to vector<8x1xf32>
    %56 = arith.addf %54, %55 : vector<8x1xf32>
    %57 = math.rsqrt %56 : vector<8x1xf32>
    %58 = vector.broadcast %57 : vector<8x1xf32> to vector<8x32xf32>
    %59 = arith.mulf %47, %58 : vector<8x32xf32>
    %60 = vector.broadcast %49 : vector<1x32xf32> to vector<8x32xf32>
    %61 = arith.mulf %59, %60 : vector<8x32xf32>
    %c0_41 = arith.constant 0 : index
    %c0_42 = arith.constant 0 : index
    %c0_43 = arith.constant 0 : index
    %62 = vector.load %arg10[%c0_41, %c0_42, %c0_43] : memref<1x32x64xf32, #tpu.memory_space<vmem>>, vector<1x32x64xf32>
    %63 = vector.shape_cast %62 : vector<1x32x64xf32> to vector<32x64xf32>
    %cst_44 = arith.constant dense<0.000000e+00> : vector<8x64xf32>
    %64 = tpu.matmul %61, %63, %cst_44 {dimension_numbers = #tpu.dot_dimension_numbers<[1], [0], [0], [1], [0, 0, 1, 1], [], []>} : vector<8x32xf32>, vector<32x64xf32>, vector<8x64xf32> -> vector<8x64xf32>
    %cst_45 = arith.constant 5.000000e-01 : f32
    %65 = vector.broadcast %cst_45 : f32 to vector<8x64xf32>
    %66 = arith.mulf %65, %64 : vector<8x64xf32>
    %cst_46 = arith.constant 4.471500e-02 : f32
    %67 = vector.broadcast %cst_46 : f32 to vector<8x64xf32>
    %68 = arith.mulf %67, %64 : vector<8x64xf32>
    %69 = arith.mulf %68, %64 : vector<8x64xf32>
    %70 = arith.mulf %69, %64 : vector<8x64xf32>
    %71 = arith.addf %64, %70 : vector<8x64xf32>
    %cst_47 = arith.constant 0.797884583 : f32
    %72 = vector.broadcast %cst_47 : f32 to vector<8x64xf32>
    %73 = arith.mulf %72, %71 : vector<8x64xf32>
    %74 = math.tanh %73 : vector<8x64xf32>
    %cst_48 = arith.constant 1.000000e+00 : f32
    %75 = vector.broadcast %cst_48 : f32 to vector<8x64xf32>
    %76 = arith.addf %75, %74 : vector<8x64xf32>
    %77 = arith.mulf %66, %76 : vector<8x64xf32>
    %c0_49 = arith.constant 0 : index
    %c0_50 = arith.constant 0 : index
    %c0_51 = arith.constant 0 : index
    %78 = vector.load %arg11[%c0_49, %c0_50, %c0_51] : memref<1x32x64xf32, #tpu.memory_space<vmem>>, vector<1x32x64xf32>
    %79 = vector.shape_cast %78 : vector<1x32x64xf32> to vector<32x64xf32>
    %cst_52 = arith.constant dense<0.000000e+00> : vector<8x64xf32>
    %80 = tpu.matmul %61, %79, %cst_52 {dimension_numbers = #tpu.dot_dimension_numbers<[1], [0], [0], [1], [0, 0, 1, 1], [], []>} : vector<8x32xf32>, vector<32x64xf32>, vector<8x64xf32> -> vector<8x64xf32>
    %81 = arith.mulf %77, %80 : vector<8x64xf32>
    %c0_53 = arith.constant 0 : index
    %c0_54 = arith.constant 0 : index
    %c0_55 = arith.constant 0 : index
    %82 = vector.load %arg12[%c0_53, %c0_54, %c0_55] : memref<1x64x32xf32, #tpu.memory_space<vmem>>, vector<1x64x32xf32>
    %83 = vector.shape_cast %82 : vector<1x64x32xf32> to vector<64x32xf32>
    %cst_56 = arith.constant dense<0.000000e+00> : vector<8x32xf32>
    %84 = tpu.matmul %81, %83, %cst_56 {dimension_numbers = #tpu.dot_dimension_numbers<[1], [0], [0], [1], [0, 0, 1, 1], [], []>} : vector<8x64xf32>, vector<64x32xf32>, vector<8x32xf32> -> vector<8x32xf32>
    %85 = arith.addf %47, %84 : vector<8x32xf32>
    %c0_57 = arith.constant 0 : index
    %c0_58 = arith.constant 0 : index
    %86 = vector.load %arg15[%c0_57, %c0_58] : memref<8x32xf32, #tpu.memory_space<vmem>>, vector<8x32xf32>
    tpu.vector_store %arg15[%c0_57, %c0_58], %85 {strides = array<i32>} : memref<8x32xf32, #tpu.memory_space<vmem>>, vector<8x32xf32>,
    %c1_i32 = arith.constant 1 : i32
    %87 = arith.cmpi eq, %arg1, %c1_i32 : i32
    %88 = arith.extui %87 : i1 to i32
    %c0_i32_59 = arith.constant 0 : i32
    %89 = arith.cmpi ne, %88, %c0_i32_59 : i32
    scf.if %89 {
      %c0_60 = arith.constant 0 : index
      %c0_61 = arith.constant 0 : index
      %90 = vector.load %arg13[%c0_60, %c0_61] : memref<1x32xf32, #tpu.memory_space<vmem>>, vector<1x32xf32>
      %91 = arith.mulf %85, %85 : vector<8x32xf32>
      %cst_62 = arith.constant dense<0.000000e+00> : vector<8xf32>
      %92 = vector.multi_reduction <add>, %91, %cst_62 [1] : vector<8x32xf32> to vector<8xf32>
      %93 = vector.shape_cast %92 : vector<8xf32> to vector<8x1xf32>
      %cst_63 = arith.constant 3.200000e+01 : f32
      %94 = vector.broadcast %cst_63 : f32 to vector<8x1xf32>
      %95 = arith.divf %93, %94 : vector<8x1xf32>
      %cst_64 = arith.constant 9.99999997E-7 : f32
      %96 = vector.broadcast %cst_64 : f32 to vector<8x1xf32>
      %97 = arith.addf %95, %96 : vector<8x1xf32>
      %98 = math.rsqrt %97 : vector<8x1xf32>
      %99 = vector.broadcast %98 : vector<8x1xf32> to vector<8x32xf32>
      %100 = arith.mulf %85, %99 : vector<8x32xf32>
      %101 = vector.broadcast %90 : vector<1x32xf32> to vector<8x32xf32>
      %102 = arith.mulf %100, %101 : vector<8x32xf32>
      %c0_65 = arith.constant 0 : index
      %c0_66 = arith.constant 0 : index
      %c0_67 = arith.constant 0 : index
      %103 = vector.load %arg14[%c0_65, %c0_66, %c0_67] : memref<1x8x32xf32, #tpu.memory_space<vmem>>, vector<1x8x32xf32>
      %104 = vector.shape_cast %103 : vector<1x8x32xf32> to vector<8x32xf32>
      %105 = vector.shape_cast %102 : vector<8x32xf32> to vector<1x8x32xf32>
      tpu.vector_store %arg14[%c0_65, %c0_66, %c0_67], %105 {strides = array<i32>} : memref<1x8x32xf32, #tpu.memory_space<vmem>>, vector<1x8x32xf32>,
    } else {
    }
    return
  }
  func.func @transform_0(%arg0: i32, %arg1: i32) -> (i32, i32, i32) {
    %c0_i32 = arith.constant 0 : i32
    %c0_i32_0 = arith.constant 0 : i32
    %c0_i32_1 = arith.constant 0 : i32
    return %arg0, %c0_i32, %c0_i32_0 : i32, i32, i32
  }
  func.func @transform_1(%arg0: i32, %arg1: i32) -> (i32, i32, i32) {
    %c0_i32 = arith.constant 0 : i32
    %c0_i32_0 = arith.constant 0 : i32
    %c0_i32_1 = arith.constant 0 : i32
    %c0_i32_2 = arith.constant 0 : i32
    return %c0_i32, %c0_i32_0, %c0_i32_1 : i32, i32, i32
  }
  func.func @transform_2(%arg0: i32, %arg1: i32) -> (i32, i32, i32) {
    %c0_i32 = arith.constant 0 : i32
    %c0_i32_0 = arith.constant 0 : i32
    %c0_i32_1 = arith.constant 0 : i32
    return %arg1, %c0_i32, %c0_i32_0 : i32, i32, i32
  }
  func.func @transform_3(%arg0: i32, %arg1: i32) -> (i32, i32, i32, i32) {
    %c0_i32 = arith.constant 0 : i32
    %c0_i32_0 = arith.constant 0 : i32
    %c0_i32_1 = arith.constant 0 : i32
    %c0_i32_2 = arith.constant 0 : i32
    return %arg1, %c0_i32, %c0_i32_0, %c0_i32_1 : i32, i32, i32, i32
  }
  func.func @transform_4(%arg0: i32, %arg1: i32) -> (i32, i32, i32, i32) {
    %c0_i32 = arith.constant 0 : i32
    %c0_i32_0 = arith.constant 0 : i32
    %c0_i32_1 = arith.constant 0 : i32
    %c0_i32_2 = arith.constant 0 : i32
    return %arg1, %c0_i32, %c0_i32_0, %c0_i32_1 : i32, i32, i32, i32
  }
  func.func @transform_5(%arg0: i32, %arg1: i32) -> (i32, i32, i32, i32) {
    %c0_i32 = arith.constant 0 : i32
    %c0_i32_0 = arith.constant 0 : i32
    %c0_i32_1 = arith.constant 0 : i32
    %c0_i32_2 = arith.constant 0 : i32
    return %arg1, %c0_i32, %c0_i32_0, %c0_i32_1 : i32, i32, i32, i32
  }
  func.func @transform_6(%arg0: i32, %arg1: i32) -> (i32, i32, i32, i32) {
    %c0_i32 = arith.constant 0 : i32
    %c0_i32_0 = arith.constant 0 : i32
    %c0_i32_1 = arith.constant 0 : i32
    %c0_i32_2 = arith.constant 0 : i32
    return %arg1, %c0_i32, %c0_i32_0, %c0_i32_1 : i32, i32, i32, i32
  }
  func.func @transform_7(%arg0: i32, %arg1: i32) -> (i32, i32, i32) {
    %c0_i32 = arith.constant 0 : i32
    %c0_i32_0 = arith.constant 0 : i32
    %c0_i32_1 = arith.constant 0 : i32
    return %arg1, %c0_i32, %c0_i32_0 : i32, i32, i32
  }
  func.func @transform_8(%arg0: i32, %arg1: i32) -> (i32, i32, i32) {
    %c0_i32 = arith.constant 0 : i32
    %c0_i32_0 = arith.constant 0 : i32
    %c0_i32_1 = arith.constant 0 : i32
    return %arg1, %c0_i32, %c0_i32_0 : i32, i32, i32
  }
  func.func @transform_9(%arg0: i32, %arg1: i32) -> (i32, i32, i32) {
    %c0_i32 = arith.constant 0 : i32
    %c0_i32_0 = arith.constant 0 : i32
    %c0_i32_1 = arith.constant 0 : i32
    return %arg1, %c0_i32, %c0_i32_0 : i32, i32, i32
  }
  func.func @transform_10(%arg0: i32, %arg1: i32) -> (i32, i32, i32) {
    %c0_i32 = arith.constant 0 : i32
    %c0_i32_0 = arith.constant 0 : i32
    %c0_i32_1 = arith.constant 0 : i32
    return %arg1, %c0_i32, %c0_i32_0 : i32, i32, i32
  }
  func.func @transform_11(%arg0: i32, %arg1: i32) -> (i32, i32) {
    %c0_i32 = arith.constant 0 : i32
    %c0_i32_0 = arith.constant 0 : i32
    %c0_i32_1 = arith.constant 0 : i32
    return %c0_i32, %c0_i32_0 : i32, i32
  }
  func.func @transform_12(%arg0: i32, %arg1: i32) -> (i32, i32, i32) {
    %c0_i32 = arith.constant 0 : i32
    %c0_i32_0 = arith.constant 0 : i32
    %c0_i32_1 = arith.constant 0 : i32
    return %arg0, %c0_i32, %c0_i32_0 : i32, i32, i32
  }
}

</mosaic_0001>

<bundles_post_ra>
// kernel: frozen_t5_embedder_forward.1
= control target key start
LH: loop header
LB: loop body
LE: loop exit
PB: predicated region body
PF: predicated region fallthrough
CT: control target
= control target key end

     0   :  { %s4070_s0 = inlined_call_operand.vmem [shape: f32[2,8,32], index: 0, kind: input, shape index: {}]   ;;  %s4071_s1 = inlined_call_operand.vmem [shape: f32[4,8,8], index: 1, kind: input, shape index: {}]   ;;  %s4072_s2 = inlined_call_operand.vmem [shape: f32[2,1,32], index: 2, kind: input, shape index: {}]   ;;  %s4073_s3 = inlined_call_operand.vmem [shape: f32[2,4,32,8], index: 3, kind: input, shape index: {}]   ;;  %s4074_s4 = inlined_call_operand.vmem [shape: f32[2,4,32,8], index: 4, kind: input, shape index: {}]   ;;  %s4075_s5 = inlined_call_operand.vmem [shape: f32[2,4,32,8], index: 5, kind: input, shape index: {}]   ;;  %s4076_s6 = inlined_call_operand.vmem [shape: f32[2,4,8,32], index: 6, kind: input, shape index: {}]   ;;  %s4077_s7 = inlined_call_operand.vmem [shape: f32[2,1,32], index: 7, kind: input, shape index: {}]   ;;  %s4078_s8 = inlined_call_operand.vmem [shape: f32[2,32,64], index: 8, kind: input, shape index: {}]   ;;  %s4079_s9 = inlined_call_operand.vmem [shape: f32[2,32,64], index: 9, kind: input, shape index: {}]   ;;  %s4080_s10 = inlined_call_operand.vmem [shape: f32[2,64,32], index: 10, kind: input, shape index: {}]   ;;  %s4081_s11 = inlined_call_operand.vmem [shape: f32[1,32], index: 11, kind: input, shape index: {}]   ;;  %s4082_s12 = inlined_call_operand.hbm [shape: f32[2,8,32], index: 12, kind: output, shape index: {}]  }
   0x1   :  { %4097 = sst [smem:[#allocation18_spill]] %s4070_s0 }
   0x2   :  { %4098 = sst [smem:[#allocation19_spill]] %s4073_s3 }
   0x3   :  { %4099 = sst [smem:[#allocation20_spill]] %s4074_s4 }
   0x4   :  { %4100 = sst [smem:[#allocation21_spill]] %s4081_s11 }
   0x5   :  { %4101 = sst [smem:[#allocation22_spill]] %s4082_s12 }
   0x6   :  { %17 = vsyncpa [#allocation4], 0 }
   0x7   :  { %19 = vsyncpa [#allocation4 + $0x1], 0  ;;  %s3586_s21 = smov 0   ;;  %s3588_s22 = smov 0  }
   0x8   :  { %s3590_s23 = smov 0   ;;  %s3592_s24 = smov 0  }
   0x9   :  { %s3594_s25 = smov 0   ;;  %s3596_s26 = smov 0  }
   0xa   :  { %s3598_s27 = smov 0   ;;  %s3600_s28 = smov 0  }
   0xb LB: > { %4102 = sst [smem:[#allocation6_spill]] %s3488_s21  ;;  %s2923_s29 = sadd.s32 4294967295, %s3516_s28   ;;  %s3516_s28 = sphi %s3600_s28, %s25_s28   ;;  %s3512_s27 = sphi %s3598_s27, %s4135_s27   ;;  %s3508_s26 = sphi %s3596_s26, %s4134_s26   ;;  %s3504_s25 = sphi %s3594_s25, %s4133_s25   ;;  %s3500_s24 = sphi %s3592_s24, %s4132_s24   ;;  %s3496_s23 = sphi %s3590_s23, %s4131_s23   ;;  %s3492_s22 = sphi %s3588_s22, %s4130_s22   ;;  %s3488_s21 = sphi %s3586_s21, %s4129_s21  }
   0xc   : > { %4103 = sst [smem:[#allocation7_spill]] %s3492_s22  ;;  %s2924_s30 = sadd.s32 4294967294, %s3516_s28  }
   0xd   : > { %4104 = sst [smem:[#allocation8_spill]] %s3496_s23  ;;  %s34_s13 = sadd.s32 1, %s3508_s26 }
   0xe   : > { %4105 = sst [smem:[#allocation9_spill]] %s3504_s25  ;;  %p35_p0 = scmp.ge.s32.totalorder %s34_s13, 2 }
   0xf   : > { %4106 = sst [smem:[#allocation10_spill]] %s3508_s26  ;;  %s37_s14 = sadd.s32 1, %s3512_s27 }
  0x10   : > { %4107 = sst [smem:[#allocation11_spill]] %s3512_s27  ;;  %p356_p1 = scmp.ne.s32.totalorder %s3496_s23, %s3492_s22 }
  0x11   : > { %4108 = sst [smem:[#allocation12_spill]] %s3516_s28  ;;  %p357_p2 = scmp.eq.s32.totalorder %s2923_s29, 3 }
  0x12   : > { %s4137_s13 = smov (%p35_p0, %s34_s13), 0  ;;  %s4139_s14 = smov (!%p35_p0, %s37_s14), %s3512_s27 }
  0x13   : > { %4109 = sst [smem:[#allocation13_spill]] %s4137_s13  ;;  %p3635_p3 = por %p357_p2, %p356_p1 }
  0x14   : > { %p362_p4 = scmp.ne.s32.totalorder %s3492_s22, %s3488_s21  ;;  %p39_p5 = scmp.ge.s32.totalorder %s4139_s14, 2 }
  0x15   : > { %s4110_s15 = scalar_select %p3635_p3, 1, 0 }
  0x16   : > { %p363_p6 = scmp.eq.s32.totalorder %s2924_s30, 3  ;;  %p2927_p7 = scmp.ge.s32.totalorder %s3516_s28, 1 }
  0x17   : > { %4111 = sst [smem:[#allocation14_spill]] %s4110_s15  ;;  %p462_p8 = scmp.lt.s32.totalorder %s3516_s28, 5 }
  0x18   : > { %s4141_s14 = smov (%p39_p5, %s4139_s14), 0  ;;  %p3645_p9 = por %p363_p6, %p362_p4 }
  0x19   : > { %4112 = sst [smem:[#allocation15_spill]] %s4141_s14  ;;  %p463_p10 = pnand %p2927_p7, %p462_p8 }
  0x1a   : > { %s4113_s16 = scalar_select %p3645_p9, 1, 0 }
  0x1b   : > { %s343_s17 = ssub.s32 %s3512_s27, %s4141_s14  ;;  %s346_s18 = sadd.s32 1, %s3496_s23 }
  0x1c   : > { %4114 = sst [smem:[#allocation16_spill]] %s4113_s16  ;;  %p344_p11 = scmp.eq.s32.totalorder %s343_s17, 0 }
  0x1d   : > { %466 = sbr.rel (%p463_p10) target bundleno = 2124 (0x84c), region = 68  ;;  %s4086_s20 = sand.u32 (!%p463_p10), 1, %s3492_s22  }
  0x1e   : > { %s3653_s19 = scalar_select %p344_p11, %s3496_s23, %s346_s18  }
  0x1f   : > { %p544_p12 = scmp.lt.s32.totalorder (!%p463_p10), %s3504_s25, 1  ;;  %s3659_s29 = sshll.u32 (!%p463_p10), %s4086_s20, 3 }
  0x20   : > { %4115 = sst [smem:[#allocation17_spill]] %s3653_s19  ;;  %p548_p13 = scmp.lt.s32.totalorder (!%p463_p10), %s3500_s24, 1 }
  0x21   : > { %s4116_s0 = sld [smem:[#allocation18_spill]] (!%p463_p10)  ;;  %s543_s26 = scalar_lea.vmem (!%p463_p10), [#allocation3], %s3659_s29 }
  0x22   : > { %s545_s30 = scalar_select %p544_p12, %s3504_s25, 1 }
  0x23   : > { %s3664_s14 = scalar_select %p548_p13, %s3500_s24, 1 }
  0x24   : > { %s2929_s17 = sshll.u32 %s545_s30, 3  ;;  %s4117_s3 = sld [smem:[#allocation19_spill]] }
  0x25   : > { %s2984_s23 = sshll.u32 %s3664_s14, 7  ;;  %s2987_s16 = sshll.u32 %s3664_s14, 5 }
  0x26   : > { %s4118_s4 = sld [smem:[#allocation20_spill]]  ;;  %s3688_s13 = scalar_lea.vmem %s4075_s5, %s2984_s23 }
  0x27   : > { %s547_s27 = scalar_lea.vmem %s4116_s0, %s2929_s17  ;;  %s3693_s19 = scalar_lea.vmem %s4076_s6, %s2987_s16 }
  0x28   : > { %s573_s21 = scalar_lea.vmem %s4077_s7, %s3664_s14  ;;  %s3702_s22 = scalar_lea.vmem %s4078_s8, %s2987_s16 }
  0x29   : > { %s3707_s11 = scalar_lea.vmem %s4079_s9, %s2987_s16  ;;  %p2944_p0 = scmp.ne.s32.totalorder %s3500_s24, 0 }
  0x2a   : > { %s3678_s12 = scalar_lea.vmem %s4117_s3, %s2984_s23 }
  0x2b   : > { %592 = sbr.rel (%p2944_p0) target bundleno = 50 (0x32), region = 72 }
  0x2c   : > { %s3683_s25 = scalar_lea.vmem %s4118_s4, %s2984_s23  ;;  %s2990_s23 = sshll.u32 %s3664_s14, 6 }
  0x2d   : > { %s3713_s17 = scalar_lea.vmem %s4080_s10, %s2990_s23 }
  0x30   : > { %v593_v0 = vld [vmem:[%s547_s27] sm:$0xff]  ;;  %vm594_vm0 = vcmask 261120  }
  0x31   : > { %595 = vst.msk [vmem:[#allocation2] sm:$0xff] %vm594_vm0, %v593_v0 }
  0x32 PF: > { %vm599_vm1 = vcmask 261120   ;;  %v3518_v4 = vmov 0.0   ;;  %v618_v5 = vld [vmem:[%s3678_s12 + $0x18] sm:$0xff]  ;;  %v617_v7 = vld [vmem:[%s3678_s12 + $0x10] sm:$0xff]  ;;  %v616_v9 = vld [vmem:[%s3678_s12 + $0x8] sm:$0xff]  ;;  %vm3519_vm2 = vmmov 0   ;;  %s4119_s4 = scalar_lea.vmem %s4072_s2, %s3664_s14 }
  0x33   : > { %3094 = vmatprep.subr.mxu1 %v3518_v4  ;;  %3116 = vmatprep.subr.mxu0 %v3518_v4  ;;  %v626_v6 = vld [vmem:[%s3678_s12 + $0x58] sm:$0xff]  ;;  %v625_v8 = vld [vmem:[%s3678_s12 + $0x50] sm:$0xff]  ;;  %v624_v10 = vld [vmem:[%s3678_s12 + $0x48] sm:$0xff]  ;;  %vm1510_vm3 = vcmask 64512   ;;  %vm2640_vm4 = vcmask 523264   ;;  %p2978_p1 = scmp.ne.s32.totalorder %s3500_s24, 1 }
  0x34   : > { %3095 = vmatpush3.msra.mxu1 %v618_v5  ;;  %3117 = vmatpush3.msra.mxu0 %v626_v6  ;;  %v615_v11 = vld [vmem:[%s3678_s12] sm:$0xff]  ;;  %v622_v20 = vld [vmem:[%s3678_s12 + $0x38] sm:$0xff]  ;;  %v621_v22 = vld [vmem:[%s3678_s12 + $0x30] sm:$0xff]  ;;  %s4120_s15 = sld [smem:[#allocation21_spill]] (!%p2978_p1) }
  0x35   : > { %3096 = vmatprep.subr.mxu1 %v3518_v4  ;;  %3118 = vmatprep.subr.mxu0 %v3518_v4  ;;  %v623_v12 = vld [vmem:[%s3678_s12 + $0x40] sm:$0xff]  ;;  %v917_v21 = vld [vmem:[%s3683_s25 + $0x18] sm:$0xff]  ;;  %v916_v23 = vld [vmem:[%s3683_s25 + $0x10] sm:$0xff] }
  0x36   : > { %3097 = vmatpush3.msra.mxu1 %v617_v7  ;;  %3119 = vmatpush3.msra.mxu0 %v625_v8  ;;  %v2945_v17 = vld [vmem:[%s4119_s4] ss:$0 sm:$0xff]  ;;  %v620_v24 = vld [vmem:[%s3678_s12 + $0x28] sm:$0xff]  ;;  %v630_v28 = vld [vmem:[%s3678_s12 + $0x78] sm:$0xff] }
  0x37   : > { %3098 = vmatprep.subr.mxu1 %v3518_v4  ;;  %3120 = vmatprep.subr.mxu0 %v3518_v4  ;;  %v915_v25 = vld [vmem:[%s3683_s25 + $0x8] sm:$0xff]  ;;  %v619_v26 = vld [vmem:[%s3678_s12 + $0x20] sm:$0xff]  ;;  %v925_v29 = vld [vmem:[%s3683_s25 + $0x58] sm:$0xff] }
  0x38   : > { %v3717_v1 = vld [vmem:[#allocation2] sm:$0xff]  ;;  %3099 = vmatpush3.msra.mxu1 %v616_v9  ;;  %3121 = vmatpush3.msra.mxu0 %v624_v10  ;;  %v629_v30 = vld [vmem:[%s3678_s12 + $0x70] sm:$0xff]  ;;  %v628_v32 = vld [vmem:[%s3678_s12 + $0x68] sm:$0xff] }
  0x39   : > { %v598_v2 = vmul.f32 %v3717_v1, %v3717_v1  ;;  %3100 = vmatprep.subr.mxu1 %v3518_v4  ;;  %3122 = vmatprep.subr.mxu0 %v3518_v4  ;;  %v914_v27 = vld [vmem:[%s3683_s25] sm:$0xff]  ;;  %v924_v31 = vld [vmem:[%s3683_s25 + $0x50] sm:$0xff]  ;;  %v923_v33 = vld [vmem:[%s3683_s25 + $0x48] sm:$0xff] }
  0x3a   : > { %3101 = vmatpush3.msra.mxu1 %v615_v11  ;;  %3123 = vmatpush3.msra.mxu0 %v623_v12  ;;  %v627_v34 = vld [vmem:[%s3678_s12 + $0x60] sm:$0xff]  ;;  %v921_v36 = vld [vmem:[%s3683_s25 + $0x38] sm:$0xff]  ;;  %v920_v38 = vld [vmem:[%s3683_s25 + $0x30] sm:$0xff] }
  0x3b   : > { %v600_v3 = vsel %vm599_vm1, %v598_v2, 0.0  ;;  %3102 = vmatprep.mubr.msk.f32.mxu1 %vm3519_vm2, %v3518_v4  ;;  %3105 = vmatprep.subr.mxu1 %v3518_v4  ;;  %v922_v35 = vld [vmem:[%s3683_s25 + $0x40] sm:$0xff]  ;;  %v1213_v37 = vld [vmem:[%s3688_s13 + $0x18] sm:$0xff]  ;;  %v1212_v39 = vld [vmem:[%s3688_s13 + $0x10] sm:$0xff] }
  0x3c   : > { %601 = vadd.xlane.f32.xlu0 %v600_v3  ;;  %3124 = vmatprep.mubr.msk.f32.mxu0 %vm3519_vm2, %v3518_v4  ;;  %v919_v40 = vld [vmem:[%s3683_s25 + $0x28] sm:$0xff]  ;;  %v918_v42 = vld [vmem:[%s3683_s25 + $0x20] sm:$0xff]  ;;  %v929_v44 = vld [vmem:[%s3683_s25 + $0x78] sm:$0xff] }
  0x3d   : > { %3138 = vmatprep.subr.mxu0 %v3518_v4  ;;  %v1211_v41 = vld [vmem:[%s3688_s13 + $0x8] sm:$0xff]  ;;  %v1210_v43 = vld [vmem:[%s3688_s13] sm:$0xff]  ;;  %v1221_v45 = vld [vmem:[%s3688_s13 + $0x58] sm:$0xff] }
  0x3e   : > { %v928_v46 = vld [vmem:[%s3683_s25 + $0x70] sm:$0xff]  ;;  %v927_v48 = vld [vmem:[%s3683_s25 + $0x68] sm:$0xff]  ;;  %v926_v50 = vld [vmem:[%s3683_s25 + $0x60] sm:$0xff] }
  0x3f   : > { %v1220_v47 = vld [vmem:[%s3688_s13 + $0x50] sm:$0xff]  ;;  %v1219_v49 = vld [vmem:[%s3688_s13 + $0x48] sm:$0xff]  ;;  %v1218_v51 = vld [vmem:[%s3688_s13 + $0x40] sm:$0xff] }
  0x40   : > { %v1217_v52 = vld [vmem:[%s3688_s13 + $0x38] sm:$0xff]  ;;  %v1216_v53 = vld [vmem:[%s3688_s13 + $0x30] sm:$0xff]  ;;  %v1215_v54 = vld [vmem:[%s3688_s13 + $0x28] sm:$0xff] }
  0x41   : > { %v1214_v55 = vld [vmem:[%s3688_s13 + $0x20] sm:$0xff]  ;;  %v1225_v56 = vld [vmem:[%s3688_s13 + $0x78] sm:$0xff]  ;;  %v1224_v57 = vld [vmem:[%s3688_s13 + $0x70] sm:$0xff] }
  0x42   : > { %v1223_v58 = vld [vmem:[%s3688_s13 + $0x68] sm:$0xff]  ;;  %v1222_v59 = vld [vmem:[%s3688_s13 + $0x60] sm:$0xff] }
  0xc5   : > { %v602_v13 = vpop.xlane.xlu0 %601 }
  0xc6   : > { %v604_v14 = vmul.f32 0.03125, %v602_v13 }
  0xc8   : > { %v605_v15 = vadd.f32 1e-06, %v604_v14 }
  0xca   : > { %3400 = vrsqrt.f32 %v605_v15 }
  0xd7   : > { %v3401_v16 = vpop.eup %3400 }
  0xd8   : > { %v607_v18 = vmul.f32 %v3401_v16, %v3717_v1 }
  0xda   : > { %v3750_v19 = vmul.f32 %v2945_v17, %v607_v18 }
  0xdc   : > { %3103 = vmatmul.mubr.msk.f32.vlgmr.msra.gmra.mxu1 %vm599_vm1, %v3750_v19  ;;  %3125 = vmatmul.mubr.msk.f32.vlgmr.msra.gmra.mxu0 %vm599_vm1, %v3750_v19 }
  0xdd   : > { %3106 = vmatpush3.msra.mxu1 %v622_v20  ;;  %3139 = vmatpush3.msra.mxu0 %v917_v21 }
  0xde   : > { %3107 = vmatprep.subr.mxu1 %v3518_v4  ;;  %3140 = vmatprep.subr.mxu0 %v3518_v4 }
  0xdf   : > { %3108 = vmatpush3.msra.mxu1 %v621_v22  ;;  %3141 = vmatpush3.msra.mxu0 %v916_v23  ;;  %v1506_v22 = vld [vmem:[%s4071_s1] sm:$0xff] }
  0xe0   : > { %3109 = vmatprep.subr.mxu1 %v3518_v4  ;;  %3142 = vmatprep.subr.mxu0 %v3518_v4 }
  0xe1   : > { %3110 = vmatpush3.msra.mxu1 %v620_v24  ;;  %3143 = vmatpush3.msra.mxu0 %v915_v25 }
  0xe2   : > { %3111 = vmatprep.subr.mxu1 %v3518_v4  ;;  %3144 = vmatprep.subr.mxu0 %v3518_v4 }
  0xe3   : > { %3112 = vmatpush3.msra.mxu1 %v619_v26  ;;  %3113 = vmatprep.mubr.msk.f32.mxu1 %vm3519_vm2, %v3518_v4 }
  0xe4   : > { %3145 = vmatpush3.msra.mxu0 %v914_v27  ;;  %3146 = vmatprep.mubr.msk.f32.mxu0 %vm3519_vm2, %v3518_v4 }
  0xe5   : > { %3114 = vmatmul.mubr.msk.f32.vlgmr.msra.gmra.mxu1 %vm599_vm1, %v3750_v19  ;;  %3127 = vmatprep.subr.mxu1 %v3518_v4 }
  0xe6   : > { %3147 = vmatmul.mubr.msk.f32.vlgmr.msra.gmra.mxu0 %vm599_vm1, %v3750_v19  ;;  %3160 = vmatprep.subr.mxu0 %v3518_v4 }
  0xe7   : > { %3128 = vmatpush3.msra.mxu1 %v630_v28  ;;  %3161 = vmatpush3.msra.mxu0 %v925_v29  ;;  %v1507_v29 = vld [vmem:[%s4071_s1 + $0x8] sm:$0xff] }
  0xe8   : > { %3129 = vmatprep.subr.mxu1 %v3518_v4  ;;  %3162 = vmatprep.subr.mxu0 %v3518_v4 }
  0xe9   : > { %3130 = vmatpush3.msra.mxu1 %v629_v30  ;;  %3163 = vmatpush3.msra.mxu0 %v924_v31  ;;  %v1508_v30 = vld [vmem:[%s4071_s1 + $0x10] sm:$0xff] }
  0xea   : > { %3131 = vmatprep.subr.mxu1 %v3518_v4  ;;  %3164 = vmatprep.subr.mxu0 %v3518_v4 }
  0xeb   : > { %3132 = vmatpush3.msra.mxu1 %v628_v32  ;;  %3165 = vmatpush3.msra.mxu0 %v923_v33 }
  0xec   : > { %3133 = vmatprep.subr.mxu1 %v3518_v4  ;;  %3166 = vmatprep.subr.mxu0 %v3518_v4 }
  0xed   : > { %3134 = vmatpush3.msra.mxu1 %v627_v34  ;;  %3135 = vmatprep.mubr.msk.f32.mxu1 %vm3519_vm2, %v3518_v4 }
  0xee   : > { %3167 = vmatpush3.msra.mxu0 %v922_v35  ;;  %3168 = vmatprep.mubr.msk.f32.mxu0 %vm3519_vm2, %v3518_v4 }
  0xef   : > { %3136 = vmatmul.mubr.msk.f32.vlgmr.msra.gmra.mxu1 %vm599_vm1, %v3750_v19  ;;  %3149 = vmatprep.subr.mxu1 %v3518_v4 }
  0xf0   : > { %3169 = vmatmul.mubr.msk.f32.vlgmr.msra.gmra.mxu0 %vm599_vm1, %v3750_v19  ;;  %3182 = vmatprep.subr.mxu0 %v3518_v4 }
  0xf1   : > { %3150 = vmatpush3.msra.mxu1 %v921_v36  ;;  %3183 = vmatpush3.msra.mxu0 %v1213_v37  ;;  %v1509_v37 = vld [vmem:[%s4071_s1 + $0x18] sm:$0xff] }
  0xf2   : > { %3151 = vmatprep.subr.mxu1 %v3518_v4  ;;  %3184 = vmatprep.subr.mxu0 %v3518_v4 }
  0xf3   : > { %3152 = vmatpush3.msra.mxu1 %v920_v38  ;;  %3185 = vmatpush3.msra.mxu0 %v1212_v39 }
  0xf4   : > { %3153 = vmatprep.subr.mxu1 %v3518_v4  ;;  %3186 = vmatprep.subr.mxu0 %v3518_v4 }
  0xf5   : > { %3154 = vmatpush3.msra.mxu1 %v919_v40  ;;  %3187 = vmatpush3.msra.mxu0 %v1211_v41 }
  0xf6   : > { %3155 = vmatprep.subr.mxu1 %v3518_v4  ;;  %3188 = vmatprep.subr.mxu0 %v3518_v4 }
  0xf7   : > { %3156 = vmatpush3.msra.mxu1 %v918_v42  ;;  %3157 = vmatprep.mubr.msk.f32.mxu1 %vm3519_vm2, %v3518_v4 }
  0xf8   : > { %3189 = vmatpush3.msra.mxu0 %v1210_v43  ;;  %3190 = vmatprep.mubr.msk.f32.mxu0 %vm3519_vm2, %v3518_v4 }
  0xf9   : > { %3158 = vmatmul.mubr.msk.f32.vlgmr.msra.gmra.mxu1 %vm599_vm1, %v3750_v19  ;;  %3171 = vmatprep.subr.mxu1 %v3518_v4 }
  0xfa   : > { %3191 = vmatmul.mubr.msk.f32.vlgmr.msra.gmra.mxu0 %vm599_vm1, %v3750_v19  ;;  %3204 = vmatprep.subr.mxu0 %v3518_v4 }
  0xfb   : > { %3172 = vmatpush3.msra.mxu1 %v929_v44  ;;  %3205 = vmatpush3.msra.mxu0 %v1221_v45 }
  0xfc   : > { %3173 = vmatprep.subr.mxu1 %v3518_v4  ;;  %3206 = vmatprep.subr.mxu0 %v3518_v4 }
  0xfd   : > { %3174 = vmatpush3.msra.mxu1 %v928_v46  ;;  %3207 = vmatpush3.msra.mxu0 %v1220_v47 }
  0xfe   : > { %3175 = vmatprep.subr.mxu1 %v3518_v4  ;;  %3208 = vmatprep.subr.mxu0 %v3518_v4 }
  0xff   : > { %3176 = vmatpush3.msra.mxu1 %v927_v48  ;;  %3209 = vmatpush3.msra.mxu0 %v1219_v49 }
 0x100   : > { %3177 = vmatprep.subr.mxu1 %v3518_v4  ;;  %3210 = vmatprep.subr.mxu0 %v3518_v4 }
 0x101   : > { %3178 = vmatpush3.msra.mxu1 %v926_v50  ;;  %3179 = vmatprep.mubr.msk.f32.mxu1 %vm3519_vm2, %v3518_v4 }
 0x102   : > { %3211 = vmatpush3.msra.mxu0 %v1218_v51  ;;  %3212 = vmatprep.mubr.msk.f32.mxu0 %vm3519_vm2, %v3518_v4 }
 0x103   : > { %3180 = vmatmul.mubr.msk.f32.vlgmr.msra.gmra.mxu1 %vm599_vm1, %v3750_v19  ;;  %3193 = vmatprep.subr.mxu1 %v3518_v4 }
 0x104   : > { %3213 = vmatmul.mubr.msk.f32.vlgmr.msra.gmra.mxu0 %vm599_vm1, %v3750_v19  ;;  %3194 = vmatpush3.msra.mxu1 %v1217_v52 }
 0x105   : > { %3195 = vmatprep.subr.mxu1 %v3518_v4  ;;  %3201 = vmatprep.mubr.msk.f32.mxu1 %vm3519_vm2, %v3518_v4 }
 0x106   : > { %3196 = vmatpush3.msra.mxu1 %v1216_v53  ;;  %3226 = vmatprep.subr.mxu0 %v3518_v4 }
 0x107   : > { %3197 = vmatprep.subr.mxu1 %v3518_v4  ;;  %3228 = vmatprep.mubr.msk.f32.mxu0 %vm3519_vm2, %v3518_v4 }
 0x108   : > { %3198 = vmatpush3.msra.mxu1 %v1215_v54 }
 0x109   : > { %3199 = vmatprep.subr.mxu1 %v3518_v4 }
 0x10a   : > { %3200 = vmatpush3.msra.mxu1 %v1214_v55 }
 0x10b   : > { %3202 = vmatmul.mubr.msk.f32.vlgmr.msra.gmra.mxu1 %vm599_vm1, %v3750_v19  ;;  %3215 = vmatprep.subr.mxu1 %v3518_v4 }
 0x10c   : > { %3216 = vmatpush3.msra.mxu1 %v1225_v56  ;;  %3223 = vmatprep.mubr.msk.f32.mxu1 %vm3519_vm2, %v3518_v4 }
 0x10d   : > { %3217 = vmatprep.subr.mxu1 %v3518_v4 }
 0x10e   : > { %3218 = vmatpush3.msra.mxu1 %v1224_v57 }
 0x10f   : > { %3219 = vmatprep.subr.mxu1 %v3518_v4 }
 0x110   : > { %3220 = vmatpush3.msra.mxu1 %v1223_v58 }
 0x111   : > { %3221 = vmatprep.subr.mxu1 %v3518_v4 }
 0x112   : > { %3222 = vmatpush3.msra.mxu1 %v1222_v59 }
 0x113   : > { %3224 = vmatmul.mubr.msk.f32.vlgmr.msra.gmra.mxu1 %vm599_vm1, %v3750_v19  ;;  %3231 = vmatprep.subr.mxu1 %v3518_v4 }
 0x114   : > { %3233 = vmatprep.mubr.msk.f32.mxu1 %vm3519_vm2, %v3518_v4 }
 0x19c   : > { %v700_v60 = vpop.f32.mrf.mxu1  ;;  %v840_v61 = vpop.f32.mrf.mxu0 }
 0x19e   : > { %v3104_v62 = vpop.f32.mrf.mxu1  ;;  %v3126_v63 = vpop.f32.mrf.mxu0 }
 0x1a5   : > { %v770_v0 = vpop.f32.mrf.mxu1 }
 0x1a6   : > { %v996_v2 = vpop.f32.mrf.mxu0 }
 0x1a7   : > { %3227 = vmatpush3.xpose.msk.msra.mxu0 %vm1510_vm3, %v996_v2  ;;  %v3115_v3 = vpop.f32.mrf.mxu1 }
 0x1a8   : > { %v3148_v5 = vpop.f32.mrf.mxu0  ;;  %3236 = vmatprep.subr.mxu0 %v3518_v4 }
 0x1aa   : > { %3229 = vmatmul.mubr.msk.f32.vlgmr.msra.gmra.mxu0 %vm1510_vm3, %v700_v60 }
 0x1ab   : > { %3238 = vmatprep.mubr.msk.f32.mxu0 %vm3519_vm2, %v3518_v4 }
 0x1af   : > { %v910_v6 = vpop.f32.mrf.mxu1 }
 0x1b0   : > { %v1136_v7 = vpop.f32.mrf.mxu0 }
 0x1b1   : > { %3237 = vmatpush3.xpose.msk.msra.mxu0 %vm1510_vm3, %v1136_v7  ;;  %v3137_v8 = vpop.f32.mrf.mxu1 }
 0x1b2   : > { %v3170_v9 = vpop.f32.mrf.mxu0  ;;  %3246 = vmatprep.subr.mxu0 %v3518_v4 }
 0x1b4   : > { %3239 = vmatmul.mubr.msk.f32.vlgmr.msra.gmra.mxu0 %vm1510_vm3, %v840_v61 }
 0x1b5   : > { %3248 = vmatprep.mubr.msk.f32.mxu0 %vm3519_vm2, %v3518_v4 }
 0x1b9   : > { %v1066_v10 = vpop.f32.mrf.mxu1 }
 0x1ba   : > { %v1292_v11 = vpop.f32.mrf.mxu0  ;;  %3232 = vmatpush3.xpose.msk.msra.mxu1 %vm1510_vm3, %v1066_v10 }
 0x1bb   : > { %3247 = vmatpush3.msra.mxu0 %v1292_v11  ;;  %v3159_v12 = vpop.f32.mrf.mxu1  ;;  %3241 = vmatprep.subr.mxu1 %v3518_v4 }
 0x1bc   : > { %v3192_v13 = vpop.f32.mrf.mxu0  ;;  %3256 = vmatprep.subr.mxu0 %v3518_v4  ;;  %v2151_v12 = vld [vmem:[%s3693_s19] sm:$0xff] }
 0x1bd   : > { %3234 = vmatmul.mubr.msk.f32.vlgmr.msra.gmra.mxu1 %vm1510_vm3, %v770_v0  ;;  %v2152_v13 = vld [vmem:[%s3693_s19 + $0x8] sm:$0xff] }
 0x1be   : > { %3243 = vmatprep.mubr.msk.f32.mxu1 %vm3519_vm2, %v3518_v4 }
 0x1c3   : > { %v1206_v14 = vpop.f32.mrf.mxu1 }
 0x1c4   : > { %v3896_v15 = vpop.f32.mrf.mxu0  ;;  %3242 = vmatpush3.xpose.msk.msra.mxu1 %vm1510_vm3, %v1206_v14  ;;  %v2153_v14 = vld [vmem:[%s3693_s19 + $0x10] sm:$0xff] }
 0x1c5   : > { %v3181_v16 = vpop.f32.mrf.mxu1  ;;  %3251 = vmatprep.subr.mxu1 %v3518_v4 }
 0x1c6   : > { %v3214_v17 = vpop.f32.mrf.mxu0 }
 0x1c7   : > { %3244 = vmatmul.mubr.msk.f32.vlgmr.msra.gmra.mxu1 %vm1510_vm3, %v910_v6  ;;  %v2154_v17 = vld [vmem:[%s3693_s19 + $0x18] sm:$0xff] }
 0x1c8   : > { %3253 = vmatprep.mubr.msk.f32.mxu1 %vm3519_vm2, %v3518_v4 }
 0x1cb   : > { %v1362_v18 = vpop.f32.mrf.mxu1 }
 0x1cc   : > { %3252 = vmatpush3.msra.mxu1 %v1362_v18 }
 0x1cd   : > { %v3203_v19 = vpop.f32.mrf.mxu1  ;;  %3261 = vmatprep.subr.mxu1 %v3518_v4 }
 0x1d3   : > { %v3904_v20 = vpop.f32.mrf.mxu1 }
 0x1d5   : > { %v3225_v21 = vpop.f32.mrf.mxu1 }
 0x26a   : > { %v1583_v23 = vpop.f32.mrf.mxu0 }
 0x26b   : > { %v1584_v24 = vadd.f32 %v1583_v23, %v1506_v22 }
 0x26c   : > { %v3230_v25 = vpop.f32.mrf.mxu0 }
 0x26d   : > { %v1815_v26 = vsel %vm1510_vm3, %v1584_v24, -inf }
 0x26e   : > { %1816 = vmax.xlane.f32.xlu0 %v1815_v26 }
 0x274   : > { %v1735_v27 = vpop.f32.mrf.mxu0 }
 0x275   : > { %v1736_v34 = vadd.f32 %v1735_v27, %v1508_v30 }
 0x276   : > { %v3240_v28 = vpop.f32.mrf.mxu0 }
 0x277   : > { %v1821_v36 = vsel %vm1510_vm3, %v1736_v34, -inf }
 0x27d   : > { %v1659_v31 = vpop.f32.mrf.mxu1 }
 0x27e   : > { %v1660_v32 = vadd.f32 %v1659_v31, %v1507_v29 }
 0x27f   : > { %v3235_v33 = vpop.f32.mrf.mxu1 }
 0x280   : > { %v1818_v35 = vsel %vm1510_vm3, %v1660_v32, -inf }
 0x281   : > { %1819 = vmax.xlane.f32.xlu1 %v1818_v35 }
 0x285   : > { %1822 = vmax.xlane.f32.xlu1 %v1821_v36 }
 0x287   : > { %v1811_v38 = vpop.f32.mrf.mxu1 }
 0x288   : > { %v1812_v39 = vadd.f32 %v1811_v38, %v1509_v37 }
 0x289   : > { %v3245_v40 = vpop.f32.mrf.mxu1 }
 0x28a   : > { %v1824_v41 = vsel %vm1510_vm3, %v1812_v39, -inf }
 0x28b   : > { %1825 = vmax.xlane.f32.xlu0 %v1824_v41 }
 0x2f7   : > { %v1817_v42 = vpop.xlane.xlu0 %1816 }
 0x2f8   : > { %v1827_v43 = vsub.f32 %v1584_v24, %v1817_v42  ;;  %v2474_v42 = vld [vmem:[%s3702_s22 + $0x18] sm:$0xff] }
 0x2fa   : > { %v1831_v44 = vmul.f32 1.442695, %v1827_v43  ;;  %v2560_v43 = vld [vmem:[%s3707_s11 + $0x18] sm:$0xff] }
 0x2fc   : > { %3402 = vpow2.f32 %v1831_v44  ;;  %v2473_v44 = vld [vmem:[%s3702_s22 + $0x10] sm:$0xff] }
 0x309   : > { %v3403_v45 = vpop.eup %3402 }
 0x30a   : > { %v1820_v46 = vpop.xlane.xlu1 %1819  ;;  %v1839_v47 = vsel %vm1510_vm3, %v3403_v45, 0.0 }
 0x30b   : > { %v1828_v48 = vsub.f32 %v1660_v32, %v1820_v46  ;;  %1840 = vadd.xlane.f32.xlu1 %v1839_v47  ;;  %v2558_v46 = vld [vmem:[%s3707_s11 + $0x8] sm:$0xff]  ;;  %v2471_v47 = vld [vmem:[%s3702_s22] sm:$0xff] }
 0x30d   : > { %v1833_v49 = vmul.f32 1.442695, %v1828_v48  ;;  %v2557_v48 = vld [vmem:[%s3707_s11] sm:$0xff] }
 0x30e   : > { %v1823_v50 = vpop.xlane.xlu1 %1822 }
 0x30f   : > { %3404 = vpow2.f32 %v1833_v49  ;;  %v1829_v51 = vsub.f32 %v1736_v34, %v1823_v50 }
 0x311   : > { %v1835_v52 = vmul.f32 1.442695, %v1829_v51 }
 0x313   : > { %3406 = vpow2.f32 %v1835_v52 }
 0x314   : > { %v1826_v53 = vpop.xlane.xlu0 %1825 }
 0x315   : > { %v1830_v54 = vsub.f32 %v1812_v39, %v1826_v53  ;;  %v2974_v53 = vld [vmem:[%s573_s21] ss:$0 sm:$0xff] }
 0x317   : > { %v1837_v55 = vmul.f32 1.442695, %v1830_v54 }
 0x319   : > { %3408 = vpow2.f32 %v1837_v55 }
 0x31c   : > { %v3405_v56 = vpop.eup %3404 }
 0x31d   : > { %v1842_v57 = vsel %vm1510_vm3, %v3405_v56, 0.0 }
 0x31e   : > { %1843 = vadd.xlane.f32.xlu0 %v1842_v57  ;;  %v2638_v57 = vld [vmem:[%s3713_s17 + $0x30] sm:$0xff] }
 0x320   : > { %v3407_v58 = vpop.eup %3406 }
 0x321   : > { %v1845_v59 = vsel %vm1510_vm3, %v3407_v58, 0.0 }
 0x322   : > { %1846 = vadd.xlane.f32.xlu1 %v1845_v59  ;;  %v2636_v59 = vld [vmem:[%s3713_s17 + $0x20] sm:$0xff] }
 0x326   : > { %v3409_v60 = vpop.eup %3408 }
 0x327   : > { %v1848_v61 = vsel %vm1510_vm3, %v3409_v60, 0.0 }
 0x328   : > { %1849 = vadd.xlane.f32.xlu0 %v1848_v61  ;;  %v2634_v61 = vld [vmem:[%s3713_s17 + $0x10] sm:$0xff] }
 0x394   : > { %v1841_v62 = vpop.xlane.xlu1 %1840 }
 0x395   : > { %3410 = vrcp.f32 %v1841_v62  ;;  %v2633_v62 = vld [vmem:[%s3713_s17 + $0x8] sm:$0xff] }
 0x3a2   : > { %v3411_v63 = vpop.eup %3410 }
 0x3a3   : > { %v1855_v0 = vmul.f32 %v3411_v63, %v3403_v45  ;;  %v2559_v45 = vld [vmem:[%s3707_s11 + $0x10] sm:$0xff]  ;;  %v2632_v63 = vld [vmem:[%s3713_s17] sm:$0xff] }
 0x3a5   : > { %3249 = vmatmul.mubr.msk.f32.vlgmr.msra.gmra.mxu0 %vm1510_vm3, %v1855_v0 }
 0x3a6   : > { %3257 = vmatpush3.msra.mxu0 %v3896_v15  ;;  %3258 = vmatprep.mubr.msk.f32.mxu0 %vm3519_vm2, %v3518_v4 }
 0x3a7   : > { %v1844_v2 = vpop.xlane.xlu0 %1843  ;;  %3266 = vmatprep.subr.mxu0 %v3518_v4 }
 0x3a8   : > { %3412 = vrcp.f32 %v1844_v2 }
 0x3ab   : > { %v1847_v3 = vpop.xlane.xlu1 %1846 }
 0x3ac   : > { %3414 = vrcp.f32 %v1847_v3 }
 0x3b1   : > { %v1850_v5 = vpop.xlane.xlu0 %1849 }
 0x3b2   : > { %3416 = vrcp.f32 %v1850_v5 }
 0x3b5   : > { %v3413_v6 = vpop.eup %3412 }
 0x3b6   : > { %v1856_v7 = vmul.f32 %v3413_v6, %v3405_v56  ;;  %v2639_v56 = vld [vmem:[%s3713_s17 + $0x38] sm:$0xff] }
 0x3b8   : > { %3254 = vmatmul.mubr.msk.f32.vlgmr.msra.gmra.mxu1 %vm1510_vm3, %v1856_v7 }
 0x3b9   : > { %v3415_v8 = vpop.eup %3414  ;;  %3262 = vmatpush3.msra.mxu1 %v3904_v20  ;;  %3263 = vmatprep.mubr.msk.f32.mxu1 %vm3519_vm2, %v3518_v4 }
 0x3ba   : > { %v1857_v9 = vmul.f32 %v3415_v8, %v3407_v58  ;;  %3271 = vmatprep.subr.mxu1 %v3518_v4  ;;  %v2637_v58 = vld [vmem:[%s3713_s17 + $0x28] sm:$0xff] }
 0x3bc   : > { %3259 = vmatmul.mubr.msk.f32.vlgmr.msra.gmra.mxu0 %vm1510_vm3, %v1857_v9 }
 0x3bd   : > { %3268 = vmatprep.mubr.msk.f32.mxu0 %vm3519_vm2, %v3518_v4  ;;  %3267 = vmatpush3.msra.mxu0 %v2151_v12 }
 0x3be   : > { %3276 = vmatprep.subr.mxu0 %v3518_v4 }
 0x3bf   : > { %v3417_v10 = vpop.eup %3416 }
 0x3c0   : > { %v1858_v11 = vmul.f32 %v3417_v10, %v3409_v60  ;;  %v2635_v60 = vld [vmem:[%s3713_s17 + $0x18] sm:$0xff] }
 0x3c2   : > { %3264 = vmatmul.mubr.msk.f32.vlgmr.msra.gmra.mxu1 %vm1510_vm3, %v1858_v11 }
 0x3c3   : > { %3273 = vmatprep.mubr.msk.f32.mxu1 %vm3519_vm2, %v3518_v4  ;;  %3272 = vmatpush3.msra.mxu1 %v2152_v13 }
 0x3c4   : > { %3281 = vmatprep.subr.mxu1 %v3518_v4 }
 0x465   : > { %v1928_v15 = vpop.f32.mrf.mxu0 }
 0x466   : > { %3269 = vmatmul.mubr.msk.f32.vlgmr.msra.gmra.mxu0 %vm1510_vm3, %v1928_v15 }
 0x467   : > { %v3250_v16 = vpop.f32.mrf.mxu0  ;;  %3277 = vmatpush3.msra.mxu0 %v2153_v14  ;;  %3278 = vmatprep.mubr.msk.f32.mxu0 %vm3519_vm2, %v3518_v4 }
 0x468   : > { %3286 = vmatprep.subr.mxu0 %v3518_v4 }
 0x478   : > { %v2001_v18 = vpop.f32.mrf.mxu1 }
 0x479   : > { %3274 = vmatmul.mubr.msk.f32.vlgmr.msra.gmra.mxu1 %vm1510_vm3, %v2001_v18 }
 0x47a   : > { %v3255_v19 = vpop.f32.mrf.mxu1  ;;  %3282 = vmatpush3.msra.mxu1 %v2154_v17  ;;  %3283 = vmatprep.mubr.msk.f32.mxu1 %vm3519_vm2, %v3518_v4 }
 0x47b   : > { %3297 = vmatprep.subr.mxu1 %v3518_v4 }
 0x47c   : > { %v2074_v20 = vpop.f32.mrf.mxu0 }
 0x47d   : > { %3279 = vmatmul.mubr.msk.f32.vlgmr.msra.gmra.mxu0 %vm1510_vm3, %v2074_v20 }
 0x47e   : > { %v3260_v21 = vpop.f32.mrf.mxu0  ;;  %3294 = vmatprep.mubr.msk.f32.mxu0 %vm3519_vm2, %v3518_v4  ;;  %3287 = vmatpush3.msra.mxu0 %v2474_v42 }
 0x47f   : > { %3288 = vmatprep.subr.mxu0 %v3518_v4 }
 0x480   : > { %3289 = vmatpush3.msra.mxu0 %v2473_v44 }
 0x481   : > { %3290 = vmatprep.subr.mxu0 %v3518_v4 }
 0x482   : > { %v2147_v22 = vpop.f32.mrf.mxu1 }
 0x483   : > { %3284 = vmatmul.mubr.msk.f32.vlgmr.msra.gmra.mxu1 %vm1510_vm3, %v2147_v22 }
 0x484   : > { %v3265_v23 = vpop.f32.mrf.mxu1  ;;  %3305 = vmatprep.mubr.msk.f32.mxu1 %vm3519_vm2, %v3518_v4  ;;  %3298 = vmatpush3.msra.mxu1 %v2560_v43 }
 0x485   : > { %3299 = vmatprep.subr.mxu1 %v3518_v4 }
 0x486   : > { %3300 = vmatpush3.msra.mxu1 %v2559_v45 }
 0x487   : > { %3301 = vmatprep.subr.mxu1 %v3518_v4 }
 0x488   : > { %3302 = vmatpush3.msra.mxu1 %v2558_v46 }
 0x489   : > { %3303 = vmatprep.subr.mxu1 %v3518_v4 }
 0x48a   : > { %3304 = vmatpush3.msra.mxu1 %v2557_v48 }
 0x526   : > { %v2224_v24 = vpop.f32.mrf.mxu0 }
 0x527   : > { %v2447_v31 = vsel %vm599_vm1, %v2224_v24, 0.0 }
 0x528   : > { %v3270_v25 = vpop.f32.mrf.mxu0 }
 0x539   : > { %v2297_v26 = vpop.f32.mrf.mxu1 }
 0x53a   : > { %v2448_v29 = vsel %vm599_vm1, %v2297_v26, 0.0 }
 0x53b   : > { %v3275_v27 = vpop.f32.mrf.mxu1  ;;  %v2449_v33 = vadd.f32 %v2448_v29, %v2447_v31 }
 0x53d   : > { %v2370_v28 = vpop.f32.mrf.mxu0 }
 0x53e   : > { %v2450_v32 = vsel %vm599_vm1, %v2370_v28, 0.0 }
 0x53f   : > { %v3280_v30 = vpop.f32.mrf.mxu0  ;;  %v2451_v34 = vadd.f32 %v2450_v32, %v2449_v33 }
 0x543   : > { %v2443_v35 = vpop.f32.mrf.mxu1 }
 0x544   : > { %v2452_v36 = vsel %vm599_vm1, %v2443_v35, 0.0 }
 0x545   : > { %v2453_v37 = vadd.f32 %v2452_v36, %v2451_v34  ;;  %v3285_v38 = vpop.f32.mrf.mxu1 }
 0x547   : > { %v3967_v39 = vadd.f32 %v2453_v37, %v3717_v1  ;;  %v2472_v1 = vld [vmem:[%s3702_s22 + $0x8] sm:$0xff] }
 0x548   : > { %3291 = vmatpush3.msra.mxu0 %v2472_v1 }
 0x549   : > { %v2456_v40 = vmul.f32 %v3967_v39, %v3967_v39  ;;  %3292 = vmatprep.subr.mxu0 %v3518_v4 }
 0x54a   : > { %3293 = vmatpush3.msra.mxu0 %v2471_v47 }
 0x54b   : > { %v2457_v41 = vsel %vm599_vm1, %v2456_v40, 0.0  ;;  %3308 = vmatprep.subr.mxu0 %v3518_v4 }
 0x54c   : > { %2458 = vadd.xlane.f32.xlu1 %v2457_v41 }
 0x5d5   : > { %v2459_v49 = vpop.xlane.xlu1 %2458 }
 0x5d6   : > { %v2460_v50 = vmul.f32 0.03125, %v2459_v49 }
 0x5d8   : > { %v2461_v51 = vadd.f32 1e-06, %v2460_v50 }
 0x5da   : > { %3418 = vrsqrt.f32 %v2461_v51 }
 0x5e7   : > { %v3419_v52 = vpop.eup %3418 }
 0x5e8   : > { %v2463_v54 = vmul.f32 %v3419_v52, %v3967_v39 }
 0x5ea   : > { %v2470_v55 = vmul.f32 %v2974_v53, %v2463_v54 }
 0x5ec   : > { %3295 = vmatmul.mubr.msk.f32.vlgmr.msra.gmra.mxu0 %vm599_vm1, %v2470_v55  ;;  %3306 = vmatmul.mubr.msk.f32.vlgmr.msra.gmra.mxu1 %vm599_vm1, %v2470_v55 }
 0x5ed   : > { %3324 = vmatprep.mubr.msk.f32.mxu0 %vm3519_vm2, %v3518_v4  ;;  %3309 = vmatpush3.msra.mxu0 %v2639_v56 }
 0x5ee   : > { %3310 = vmatprep.subr.mxu0 %v3518_v4 }
 0x5ef   : > { %3311 = vmatpush3.msra.mxu0 %v2638_v57 }
 0x5f0   : > { %3312 = vmatprep.subr.mxu0 %v3518_v4 }
 0x5f1   : > { %3313 = vmatpush3.msra.mxu0 %v2637_v58 }
 0x5f2   : > { %3314 = vmatprep.subr.mxu0 %v3518_v4 }
 0x5f3   : > { %3315 = vmatpush3.msra.mxu0 %v2636_v59 }
 0x5f4   : > { %3316 = vmatprep.subr.mxu0 %v3518_v4 }
 0x5f5   : > { %3317 = vmatpush3.msra.mxu0 %v2635_v60 }
 0x5f6   : > { %3318 = vmatprep.subr.mxu0 %v3518_v4 }
 0x5f7   : > { %3319 = vmatpush3.msra.mxu0 %v2634_v61 }
 0x5f8   : > { %3320 = vmatprep.subr.mxu0 %v3518_v4 }
 0x5f9   : > { %3321 = vmatpush3.msra.mxu0 %v2633_v62 }
 0x5fa   : > { %3322 = vmatprep.subr.mxu0 %v3518_v4 }
 0x5fb   : > { %3323 = vmatpush3.msra.mxu0 %v2632_v63 }
 0x6ac   : > { %v2544_v0 = vpop.f32.mrf.mxu0  ;;  %v2627_v2 = vpop.f32.mrf.mxu1 }
 0x6ad   : > { %v2549_v3 = vmul.f32 0.044715, %v2544_v0  ;;  %v2548_v12 = vmul.f32 0.5, %v2544_v0 }
 0x6ae   : > { %v3296_v5 = vpop.f32.mrf.mxu0  ;;  %v3307_v6 = vpop.f32.mrf.mxu1 }
 0x6af   : > { %v2550_v7 = vmul.f32 %v2549_v3, %v2544_v0 }
 0x6b1   : > { %v2551_v8 = vmul.f32 %v2550_v7, %v2544_v0 }
 0x6b3   : > { %v2552_v9 = vadd.f32 %v2551_v8, %v2544_v0 }
 0x6b5   : > { %v2553_v10 = vmul.f32 0.7978846, %v2552_v9 }
 0x6b7   : > { %3420 = vtanh.f32 %v2553_v10 }
 0x6c4   : > { %v3421_v11 = vpop.eup %3420 }
 0x6c5   : > { %v2555_v13 = vadd.f32 1.0, %v3421_v11 }
 0x6c7   : > { %v2556_v14 = vmul.f32 %v2555_v13, %v2548_v12 }
 0x6c9   : > { %v2631_v15 = vmul.f32 %v2627_v2, %v2556_v14 }
 0x6cb   : > { %3325 = vmatmul.mubr.msk.f32.vlgmr.msra.gmra.mxu0 %vm2640_vm4, %v2631_v15 }
 0x78a   : > { %2719 = sbr.rel (%p2978_p1) target bundleno = 2099 (0x833), region = 76 }
 0x78b   : > { %v2710_v16 = vpop.f32.mrf.mxu0 }
 0x78c   : > { %v2714_v4 = vadd.f32 %v2710_v16, %v3967_v39 }
 0x78d   : > { %v3326_v17 = vpop.f32.mrf.mxu0 }
 0x78e   : > { %2715 = vst.msk [vmem:[#allocation2] sm:$0xff] %vm599_vm1, %v2714_v4 }
 0x78f   : > { %v2721_v18 = vmul.f32 %v2714_v4, %v2714_v4  ;;  %v2979_v24 = vld [vmem:[%s4120_s15] ss:$0 sm:$0xff] }
 0x791   : > { %v2722_v19 = vsel %vm599_vm1, %v2721_v18, 0.0 }
 0x792   : > { %2723 = vadd.xlane.f32.xlu0 %v2722_v19 }
 0x81b   : > { %v2724_v20 = vpop.xlane.xlu0 %2723 }
 0x81c   : > { %v2725_v21 = vmul.f32 0.03125, %v2724_v20 }
 0x81e   : > { %v2726_v22 = vadd.f32 1e-06, %v2725_v21 }
 0x820   : > { %3422 = vrsqrt.f32 %v2726_v22 }
 0x82d   : > { %v3423_v23 = vpop.eup %3422 }
 0x82e   : > { %v2728_v25 = vmul.f32 %v3423_v23, %v2714_v4 }
 0x830   : > { %v2735_v26 = vmul.f32 %v2979_v24, %v2728_v25 }
 0x832   : > { %2736 = vst.msk [vmem:[%s543_s26] sm:$0xff] %vm599_vm1, %v2735_v26 }
 0x833 PF: > { %s4121_s24 = sld [smem:[#allocation9_spill]]  ;;  %s2751_s12 = sshll.u32 %s543_s26, 4  ;;  %s2752_s12 = int_to_ptr.vmem [resolvable:$true] %s2751_s12 }
 0x834   : > { %s4122_s11 = sld [smem:[#allocation7_spill]]  ;;  %s3424_s16 = scalar_lea.vmem %s2752_s12, 128 }
 0x835   : > { %s4124_s3 = sld [smem:[#allocation22_spill]]  ;;  %p3425_p2 = scmp.ne.s32.totalorder %s2752_s12, %s3424_s16 }
 0x836   : > { %s3520_s20 = smov [#allocation3]  }
 0x837   : > { %p3426_p4 = pnand %p3425_p2, %p3635_p3  ;;  %s3428_s13 = sshll.u32 %s3520_s20, 4  ;;  %s3429_s13 = int_to_ptr.vmem [resolvable:$false] %s3428_s13 }
 0x838   : > { %s3430_s18 = scalar_lea.vmem %s3429_s13, 256  ;;  %p3431_p6 = scmp.lt.s32.totalorder %s2752_s12, %s3429_s13 }
 0x839   : > { %s2981_s30 = sshll.u32 %s4121_s24, 7  ;;  %p3427_p5 = pneg %p3426_p4 }
 0x83a   : > { %s4125_s25 = sand.u32 1, %s4122_s11   ;;  %p3432_p7 = scmp.lt.s32.totalorder %s3430_s18, %s3424_s16 }
 0x83b   : > { %s2749_s4 = scalar_lea.hbm %s4124_s3, %s2981_s30  ;;  %s2738_s27 = scalar_lea.sflag [#allocation4], %s4125_s25 }
 0x83c   : > { %p3433_p8 = por %p3432_p7, %p3431_p6 }
 0x83e   : > { %p3434_p10 = pnand %p3433_p8, %p3427_p5 }
 0x840   : > { %3437 = shalt.err (!%p3434_p10)
}
 0x841   : > { %s3438_s28 = scalar_lea.hbm %s2749_s4, 128  ;;  %s3442_s19 = scalar_lea.hbm %s4124_s3, 256 }
 0x842   : > { %p3439_p11 = scmp.ne.s32.totalorder %s2749_s4, %s3438_s28  ;;  %p3443_p0 = scmp.lt.s32.totalorder %s2749_s4, %s4124_s3 }
 0x843   : > { %p3444_p1 = scmp.lt.s32.totalorder %s3442_s19, %s3438_s28 }
 0x844   : > { %p3440_p12 = pnand %p3439_p11, %p3635_p3 }
 0x845   : > { %p3445_p2 = por %p3444_p1, %p3443_p0 }
 0x846   : > { %p3441_p13 = pneg %p3440_p12 }
 0x848   : > { %p3446_p4 = pnand %p3445_p2, %p3441_p13 }
 0x84a   : > { %3449 = shalt.err (!%p3446_p4)
}
 0x84b   : > { %3327 = dma.vmem_to_hbm [thread:$0]  (%p3635_p3), %s2752_s12, 128, %s2749_s4, %s2738_s27  }
 0x84c PF: > { %s4126_s21 = sld [smem:[#allocation12_spill]] }
 0x84d   : > { %s4127_s15 = sld [smem:[#allocation6_spill]] }
 0x852   : > { %p3333_p5 = scmp.ge.s32.totalorder %s4126_s21, 2 }
 0x853   : > { %s2763_s11 = sand.u32 1, %s4127_s15  }
 0x854   : > { %p3330_p6 = pnand %p3333_p5, %p3645_p9  ;;  %s2764_s30 = scalar_lea.sflag [#allocation4], %s2763_s11 }
 0x856   : > { %p3331_p7 = pneg %p3330_p6 }
 0x858   : > { %3483 = dma.done.wait (%p3331_p7), %s2764_s30, 128  }
 0x859   : > { %3485 = vsyncadd (%p3331_p7), %s2764_s30, 4294967168  ;;  %s25_s28 = sadd.s32 1, %s4126_s21   ;;  %s4129_s21 = sld [smem:[#allocation7_spill]] }
 0x85a   : > { %p22_p8 = scmp.ge.s32.totalorder %s25_s28, 6   ;;  %s4130_s22 = sld [smem:[#allocation8_spill]] }
 0x85b   : > { %s4131_s23 = sld [smem:[#allocation17_spill]] }
 0x85c   : > { %s4132_s24 = sld [smem:[#allocation10_spill]]  ;;  %24 = sbr.rel (!%p22_p8) target bundleno = 11 (0xb), region = 138 }
 0x85d   : > { %s4133_s25 = sld [smem:[#allocation11_spill]] }
 0x85e   : > { %s4134_s26 = sld [smem:[#allocation13_spill]] }
 0x85f   : > { %s4135_s27 = sld [smem:[#allocation15_spill]] }
 0x861   :  { %2769 = vsyncpa [#allocation4], 1 }
 0x862   :  { %2771 = vsyncpa [#allocation4 + $0x1], 1 }

</bundles_post_ra>
